<compile_context>
chip_gen: v7x
topology: tpu7x:2x2x1
jax: 0.10.0
libtpu: 0.0.40
codegen_flags: <defaults>
</compile_context>

<pallas_src>
import functools

import jax
import jax.numpy as jnp
from jax import lax
from jax.experimental import pallas as pl
from jax.experimental.pallas import tpu as pltpu


def dt_kernel(u_ref, w1_ref, w23_ref, w4_ref, b_ref, o_ref):
    u = u_ref[...]                                  # (TB, E) f32, kept for the distance
    wdt = w1_ref.dtype                              # bf16 (fast path) or f32
    E, H = w1_ref.shape

    # Biases were stacked into one (3, P) f32 array: [b1 | b23 | b4], each padded to P lanes.
    b1 = b_ref[0:1, 0:H]                            # (1, H)
    b23 = b_ref[1:2, 0:H]                           # (1, H)
    b4 = b_ref[2:3, 0:E]                            # (1, E)

    # ---- encoder: Linear(E->H) + ReLU ----
    h = jnp.dot(u.astype(wdt), w1_ref[...], preferred_element_type=jnp.float32) + b1
    h = jnp.maximum(h, 0.0)

    # ---- fused encoder-out Linear(H->E) @ decoder-in Linear(E->H), then ReLU ----
    h2 = jnp.dot(h.astype(wdt), w23_ref[...], preferred_element_type=jnp.float32) + b23
    h2 = jnp.maximum(h2, 0.0)

    # ---- decoder: Linear(H->E) ----
    x = jnp.dot(h2.astype(wdt), w4_ref[...], preferred_element_type=jnp.float32) + b4

    # ---- F.normalize(x, dim=1) == x / max(||x||_2, 1e-12) ----
    sumsq = jnp.sum(x * x, axis=1, keepdims=True)           # (TB, 1)
    inv_norm = lax.rsqrt(jnp.maximum(sumsq, 1e-24))          # 1 / max(norm, 1e-12), via EUP
    x = x * inv_norm

    # ---- per-row distance ||x - u||_2 ; mean is taken outside the kernel ----
    d = x - u
    o_ref[...] = jnp.sqrt(jnp.sum(d * d, axis=1, keepdims=True))   # (TB, 1)


def prepare_dt_params(w1, b1, w2, b2, w3, b3, w4, b4, *, param_dtype=jnp.bfloat16):
    """One-time parameter preparation (hoisted out of the per-call path).

    Weights are given pre-transposed to (in, out); biases shaped (1, out), f32.
    Fuses the back-to-back Linears (no nonlinearity in between) and casts weights to
    `param_dtype` (biases stay f32). Returns a dict consumed by dt_model_forward.
    """
    w23 = (w2 @ w3).astype(param_dtype)                       # (H, H)
    b23 = b2 @ w3 + b3                                        # (1, H), f32

    # Stack the three biases into one lane-dense (3, P) f32 array -> single DMA.
    pad_to = max(b1.shape[1], b23.shape[1], b4.shape[1])

    def _pad(b):
        return jnp.pad(b, ((0, 0), (0, pad_to - b.shape[1])))

    biases = jnp.concatenate([_pad(b1), _pad(b23), _pad(b4)], axis=0)   # (3, P) f32

    return dict(
        w1=w1.astype(param_dtype),
        w23=w23,
        w4=w4.astype(param_dtype),
        biases=biases,
    )


def dt_model_forward(u, params, *, tb=128):
    """u: (B, E) f32; params: output of prepare_dt_params. Returns the scalar mean distance."""
    B, E = u.shape
    H = params["w1"].shape[1]
    P = params["biases"].shape[1]

    num_tiles = (B + tb - 1) // tb
    b_pad = num_tiles * tb
    if b_pad != B:
        u = jnp.pad(u, ((0, b_pad - B), (0, 0)))              # padded rows sliced away below

    wbytes = params["w1"].dtype.itemsize
    cost = pl.CostEstimate(
        flops=2 * b_pad * (E * H + H * H + H * E),
        transcendentals=2 * b_pad,                             # rsqrt + sqrt per row
        bytes_accessed=(E * H + H * H + H * E) * wbytes + 3 * P * 4 + b_pad * E * 4 + b_pad * 4,
    )

    row_dist = pl.pallas_call(
        dt_kernel,
        out_shape=jax.ShapeDtypeStruct((b_pad, 1), jnp.float32),
        grid_spec=pltpu.PrefetchScalarGridSpec(
            num_scalar_prefetch=0,
            grid=(num_tiles,),
            in_specs=[
                pl.BlockSpec((tb, E), lambda i: (i, 0)),       # u: streamed per batch tile
                pl.BlockSpec((E, H), lambda i: (0, 0)),        # w1:   VMEM-resident
                pl.BlockSpec((H, H), lambda i: (0, 0)),        # w23:  VMEM-resident
                pl.BlockSpec((H, E), lambda i: (0, 0)),        # w4:   VMEM-resident
                pl.BlockSpec((3, P), lambda i: (0, 0)),        # biases: VMEM-resident
            ],
            out_specs=pl.BlockSpec((tb, 1), lambda i: (i, 0)), # disjoint per-tile rows
        ),
        compiler_params=pltpu.CompilerParams(
            dimension_semantics=("parallel",),                 # shard batch tiles across TCs
        ),
        cost_estimate=cost,
    )(u, params["w1"], params["w23"], params["w4"], params["biases"])

    # Masked mean over the real rows (padded tail rows dropped); tiny XLA reduce, fuses under jit.
    return jnp.sum(row_dist[:B, 0]) / B


def _reference(u, w1, b1, w2, b2, w3, b3, w4, b4):
    """Pure-JAX f32 reference with the original (unfused) PyTorch structure."""
    h = jnp.maximum(u @ w1 + b1, 0.0)
    x = h @ w2 + b2
    h2 = jnp.maximum(x @ w3 + b3, 0.0)
    x = h2 @ w4 + b4
    n = jnp.sqrt(jnp.sum(x * x, axis=1, keepdims=True))
    x = x / jnp.maximum(n, 1e-12)
    d = x - u
    return jnp.mean(jnp.sqrt(jnp.sum(d * d, axis=1)))


if __name__ == "__main__":
    # Small shapes consistent with the module's (embedding_dim, hidden_dim) Linears.
    # B is intentionally NOT a multiple of TB to exercise the padded / ragged-tail path.
    B, E, H = 500, 256, 128
    TB = 128

    key = jax.random.PRNGKey(0)
    ku, k1, k2, k3, k4, kb1, kb2, kb3, kb4 = jax.random.split(key, 9)

    u = jax.random.normal(ku, (B, E), dtype=jnp.float32)

    # Deterministic parameter init (already transposed to (in, out)); biases are (1, out).
    scale_e = 1.0 / jnp.sqrt(jnp.float32(E))
    scale_h = 1.0 / jnp.sqrt(jnp.float32(H))
    w1 = jax.random.uniform(k1, (E, H), jnp.float32, -scale_e, scale_e)
    b1 = jax.random.uniform(kb1, (1, H), jnp.float32, -scale_e, scale_e)
    w2 = jax.random.uniform(k2, (H, E), jnp.float32, -scale_h, scale_h)
    b2 = jax.random.uniform(kb2, (1, E), jnp.float32, -scale_h, scale_h)
    w3 = jax.random.uniform(k3, (E, H), jnp.float32, -scale_e, scale_e)
    b3 = jax.random.uniform(kb3, (1, H), jnp.float32, -scale_e, scale_e)
    w4 = jax.random.uniform(k4, (H, E), jnp.float32, -scale_h, scale_h)
    b4 = jax.random.uniform(kb4, (1, E), jnp.float32, -scale_h, scale_h)

    ref = _reference(u, w1, b1, w2, b2, w3, b3, w4, b4)

    # One-time prep (fusion + casts) hoisted out of the per-call path; forward is jitted.
    fwd = jax.jit(functools.partial(dt_model_forward, tb=TB))

    # Fast path: bf16 weight storage, f32 accumulation (looser tolerance due to bf16 rounding).
    params_bf16 = prepare_dt_params(w1, b1, w2, b2, w3, b3, w4, b4, param_dtype=jnp.bfloat16)
    dist_bf16 = jax.block_until_ready(fwd(u, params_bf16))
    assert jnp.allclose(dist_bf16, ref, rtol=5e-3, atol=1e-3), (dist_bf16, ref)

    # Full-precision path: validates forward semantics (incl. the w2@w3 fusion and padding).
    params_f32 = prepare_dt_params(w1, b1, w2, b2, w3, b3, w4, b4, param_dtype=jnp.float32)
    dist_f32 = jax.block_until_ready(fwd(u, params_f32))
    assert jnp.allclose(dist_f32, ref, rtol=5e-4, atol=1e-4), (dist_f32, ref)

    print("KERNEL_OK")
</pallas_src>

<mosaic_0001>
module attributes {stable_mosaic.version = 11 : i64} {
  func.func @dt_kernel(%arg0: i32, %arg1: memref<128x256xf32, #tpu.memory_space<vmem>>, %arg2: memref<256x128xbf16, #tpu.memory_space<vmem>>, %arg3: memref<128x128xbf16, #tpu.memory_space<vmem>>, %arg4: memref<128x256xbf16, #tpu.memory_space<vmem>>, %arg5: memref<3x256xf32, #tpu.memory_space<vmem>>, %arg6: memref<128x1xf32, #tpu.memory_space<vmem>>) attributes {dimension_semantics = [#tpu.dimension_semantics<parallel>], iteration_bounds = array<i64: 4>, scalar_prefetch = 0 : i64, scratch_operands = 0 : i64, tpu.core_type = #tpu.core_type<tc>, window_params = [{transform_indices = @transform_0, window_bounds = array<i64: 128, 256>}, {pipeline_mode = #tpu.pipeline_mode<synchronous>, transform_indices = @transform_1, window_bounds = array<i64: 256, 128>}, {pipeline_mode = #tpu.pipeline_mode<synchronous>, transform_indices = @transform_2, window_bounds = array<i64: 128, 128>}, {pipeline_mode = #tpu.pipeline_mode<synchronous>, transform_indices = @transform_3, window_bounds = array<i64: 128, 256>}, {pipeline_mode = #tpu.pipeline_mode<synchronous>, transform_indices = @transform_4, window_bounds = array<i64: 3, 256>}, {transform_indices = @transform_5, window_bounds = array<i64: 128, 1>}]} {
    %c0 = arith.constant 0 : index
    %c0_0 = arith.constant 0 : index
    %0 = vector.load %arg1[%c0, %c0_0] : memref<128x256xf32, #tpu.memory_space<vmem>>, vector<128x256xf32>
    %c0_1 = arith.constant 0 : index
    %c0_2 = arith.constant 0 : index
    %1 = vector.load %arg5[%c0_1, %c0_2] : memref<3x256xf32, #tpu.memory_space<vmem>>, vector<1x128xf32>
    %c1 = arith.constant 1 : index
    %c0_3 = arith.constant 0 : index
    %2 = vector.load %arg5[%c1, %c0_3] : memref<3x256xf32, #tpu.memory_space<vmem>>, vector<1x128xf32>
    %c2 = arith.constant 2 : index
    %c0_4 = arith.constant 0 : index
    %3 = vector.load %arg5[%c2, %c0_4] : memref<3x256xf32, #tpu.memory_space<vmem>>, vector<1x256xf32>
    %4 = arith.truncf %0 : vector<128x256xf32> to vector<128x256xbf16>
    %c0_5 = arith.constant 0 : index
    %c0_6 = arith.constant 0 : index
    %5 = vector.load %arg2[%c0_5, %c0_6] : memref<256x128xbf16, #tpu.memory_space<vmem>>, vector<256x128xbf16>
    %cst = arith.constant dense<0.000000e+00> : vector<128x128xf32>
    %6 = tpu.matmul %4, %5, %cst {dimension_numbers = #tpu.dot_dimension_numbers<[1], [0], [0], [1], [0, 0, 1, 1], [], []>} : vector<128x256xbf16>, vector<256x128xbf16>, vector<128x128xf32> -> vector<128x128xf32>
    %7 = vector.broadcast %1 : vector<1x128xf32> to vector<128x128xf32>
    %8 = arith.addf %6, %7 : vector<128x128xf32>
    %cst_7 = arith.constant 0.000000e+00 : f32
    %9 = vector.broadcast %cst_7 : f32 to vector<128x128xf32>
    %10 = arith.maximumf %8, %9 : vector<128x128xf32>
    %11 = arith.truncf %10 : vector<128x128xf32> to vector<128x128xbf16>
    %c0_8 = arith.constant 0 : index
    %c0_9 = arith.constant 0 : index
    %12 = vector.load %arg3[%c0_8, %c0_9] : memref<128x128xbf16, #tpu.memory_space<vmem>>, vector<128x128xbf16>
    %cst_10 = arith.constant dense<0.000000e+00> : vector<128x128xf32>
    %13 = tpu.matmul %11, %12, %cst_10 {dimension_numbers = #tpu.dot_dimension_numbers<[1], [0], [0], [1], [0, 0, 1, 1], [], []>} : vector<128x128xbf16>, vector<128x128xbf16>, vector<128x128xf32> -> vector<128x128xf32>
    %14 = vector.broadcast %2 : vector<1x128xf32> to vector<128x128xf32>
    %15 = arith.addf %13, %14 : vector<128x128xf32>
    %cst_11 = arith.constant 0.000000e+00 : f32
    %16 = vector.broadcast %cst_11 : f32 to vector<128x128xf32>
    %17 = arith.maximumf %15, %16 : vector<128x128xf32>
    %18 = arith.truncf %17 : vector<128x128xf32> to vector<128x128xbf16>
    %c0_12 = arith.constant 0 : index
    %c0_13 = arith.constant 0 : index
    %19 = vector.load %arg4[%c0_12, %c0_13] : memref<128x256xbf16, #tpu.memory_space<vmem>>, vector<128x256xbf16>
    %cst_14 = arith.constant dense<0.000000e+00> : vector<128x256xf32>
    %20 = tpu.matmul %18, %19, %cst_14 {dimension_numbers = #tpu.dot_dimension_numbers<[1], [0], [0], [1], [0, 0, 1, 1], [], []>} : vector<128x128xbf16>, vector<128x256xbf16>, vector<128x256xf32> -> vector<128x256xf32>
    %21 = vector.broadcast %3 : vector<1x256xf32> to vector<128x256xf32>
    %22 = arith.addf %20, %21 : vector<128x256xf32>
    %23 = arith.mulf %22, %22 : vector<128x256xf32>
    %cst_15 = arith.constant dense<0.000000e+00> : vector<128xf32>
    %24 = vector.multi_reduction <add>, %23, %cst_15 [1] : vector<128x256xf32> to vector<128xf32>
    %25 = vector.shape_cast %24 : vector<128xf32> to vector<128x1xf32>
    %cst_16 = arith.constant 1.000000e-24 : f32
    %26 = vector.broadcast %cst_16 : f32 to vector<128x1xf32>
    %27 = arith.maximumf %25, %26 : vector<128x1xf32>
    %28 = math.rsqrt %27 : vector<128x1xf32>
    %29 = vector.broadcast %28 : vector<128x1xf32> to vector<128x256xf32>
    %30 = arith.mulf %22, %29 : vector<128x256xf32>
    %31 = arith.subf %30, %0 : vector<128x256xf32>
    %32 = arith.mulf %31, %31 : vector<128x256xf32>
    %cst_17 = arith.constant dense<0.000000e+00> : vector<128xf32>
    %33 = vector.multi_reduction <add>, %32, %cst_17 [1] : vector<128x256xf32> to vector<128xf32>
    %34 = vector.shape_cast %33 : vector<128xf32> to vector<128x1xf32>
    %35 = math.sqrt %34 : vector<128x1xf32>
    %c0_18 = arith.constant 0 : index
    %c0_19 = arith.constant 0 : index
    %36 = vector.load %arg6[%c0_18, %c0_19] : memref<128x1xf32, #tpu.memory_space<vmem>>, vector<128x1xf32>
    tpu.vector_store %arg6[%c0_18, %c0_19], %35 {strides = array<i32>} : memref<128x1xf32, #tpu.memory_space<vmem>>, vector<128x1xf32>,
    return
  }
  func.func @transform_0(%arg0: i32) -> (i32, i32) {
    %c0_i32 = arith.constant 0 : i32
    %c0_i32_0 = arith.constant 0 : i32
    return %arg0, %c0_i32 : i32, i32
  }
  func.func @transform_1(%arg0: i32) -> (i32, i32) {
    %c0_i32 = arith.constant 0 : i32
    %c0_i32_0 = arith.constant 0 : i32
    %c0_i32_1 = arith.constant 0 : i32
    return %c0_i32, %c0_i32_0 : i32, i32
  }
  func.func @transform_2(%arg0: i32) -> (i32, i32) {
    %c0_i32 = arith.constant 0 : i32
    %c0_i32_0 = arith.constant 0 : i32
    %c0_i32_1 = arith.constant 0 : i32
    return %c0_i32, %c0_i32_0 : i32, i32
  }
  func.func @transform_3(%arg0: i32) -> (i32, i32) {
    %c0_i32 = arith.constant 0 : i32
    %c0_i32_0 = arith.constant 0 : i32
    %c0_i32_1 = arith.constant 0 : i32
    return %c0_i32, %c0_i32_0 : i32, i32
  }
  func.func @transform_4(%arg0: i32) -> (i32, i32) {
    %c0_i32 = arith.constant 0 : i32
    %c0_i32_0 = arith.constant 0 : i32
    %c0_i32_1 = arith.constant 0 : i32
    return %c0_i32, %c0_i32_0 : i32, i32
  }
  func.func @transform_5(%arg0: i32) -> (i32, i32) {
    %c0_i32 = arith.constant 0 : i32
    %c0_i32_0 = arith.constant 0 : i32
    return %arg0, %c0_i32 : i32, i32
  }
}

</mosaic_0001>

<bundles_post_ra>
// kernel: dt_model_forward.1
= control target key start
LH: loop header
LB: loop body
LE: loop exit
PB: predicated region body
PF: predicated region fallthrough
CT: control target
= control target key end

     0   :  { %s1748_s18 = smov 0   ;;  %s2289_s0 = inlined_call_operand.vmem [shape: f32[512,256], index: 0, kind: input, shape index: {}]   ;;  %s2290_s1 = inlined_call_operand.vmem [shape: bf16[256,128], index: 1, kind: input, shape index: {}]   ;;  %s2291_s2 = inlined_call_operand.vmem [shape: bf16[128,128], index: 2, kind: input, shape index: {}]   ;;  %s2292_s3 = inlined_call_operand.vmem [shape: bf16[128,256], index: 3, kind: input, shape index: {}]   ;;  %s2293_s4 = inlined_call_operand.vmem [shape: f32[3,256], index: 4, kind: input, shape index: {}]   ;;  %s2294_s5 = inlined_call_operand.vmem [shape: f32[512,1], index: 5, kind: output, shape index: {}]  }
   0x1 LB: > { %s1387_s19 = sadd.s32 4294967295, %s1715_s18   ;;  %p1391_p0 = scmp.ge.s32.totalorder %s1715_s18, 1  ;;  %s1715_s18 = sphi %s1748_s18, %s15_s18  }
   0x2   : > { %p189_p1 = scmp.lt.s32.totalorder %s1715_s18, 5 }
   0x4   : > { %p190_p2 = pnand %p1391_p0, %p189_p1 }
   0x5   : > { %v1580_v0 = vld [vmem:[%s2290_s1 + $0x40] sm:$0xff] (!%p190_p2)   ;;  %s1392_s22 = sshll.u32 (!%p190_p2), %s1387_s19, 4  ;;  %v1582_v2 = vld [vmem:[%s2290_s1 + $0x48] sm:$0xff] (!%p190_p2)   ;;  %v1584_v4 = vld [vmem:[%s2290_s1 + $0x50] sm:$0xff] (!%p190_p2)   ;;  %vm1314_vm0 = vcmask (!%p190_p2), 7168  }
   0x6   : > { %193 = sbr.rel (%p190_p2) target bundleno = 1088 (0x440), region = 40  ;;  %v1581_v1 = vld [vmem:[%s2290_s1] sm:$0xff] (!%p190_p2)   ;;  %1443 = vmatprep.subr.bf16.mxu0 (!%p190_p2), %v1580_v0  ;;  %p219_p3 = scmp.lt.s32.totalorder (!%p190_p2), %s1392_s22, 63  ;;  %v1583_v3 = vld [vmem:[%s2290_s1 + $0x8] sm:$0xff] (!%p190_p2)   ;;  %v1585_v5 = vld [vmem:[%s2290_s1 + $0x10] sm:$0xff] (!%p190_p2)  }
   0x7   : > { %1444 = vmatpush3.bf16.msra.mxu0 (!%p190_p2), %v1581_v1  ;;  %v1586_v6 = vld [vmem:[%s2290_s1 + $0x58] sm:$0xff] (!%p190_p2)   ;;  %v1588_v8 = vld [vmem:[%s2290_s1 + $0x60] sm:$0xff] (!%p190_p2)   ;;  %v1590_v10 = vld [vmem:[%s2290_s1 + $0x68] sm:$0xff] (!%p190_p2)  }
   0x8   : > { %1445 = vmatprep.subr.bf16.mxu0 (!%p190_p2), %v1582_v2  ;;  %v1587_v7 = vld [vmem:[%s2290_s1 + $0x18] sm:$0xff] (!%p190_p2)   ;;  %v1589_v9 = vld [vmem:[%s2290_s1 + $0x20] sm:$0xff] (!%p190_p2)   ;;  %v1591_v14 = vld [vmem:[%s2290_s1 + $0x28] sm:$0xff] (!%p190_p2)  }
   0x9   : > { %v1592_v15 = vld [vmem:[%s2290_s1 + $0x70] sm:$0xff] (!%p190_p2)   ;;  %v1594_v17 = vld [vmem:[%s2290_s1 + $0x78] sm:$0xff] (!%p190_p2)   ;;  %v1596_v23 = vld [vmem:[%s2291_s2] sm:$0xff] (!%p190_p2)  }
   0xa   : > { %v1593_v16 = vld [vmem:[%s2290_s1 + $0x30] sm:$0xff] (!%p190_p2)   ;;  %v1595_v18 = vld [vmem:[%s2290_s1 + $0x38] sm:$0xff] (!%p190_p2)   ;;  %v1597_v24 = vld [vmem:[%s2291_s2 + $0x8] sm:$0xff] (!%p190_p2)   ;;  %1523 = vmatprep.subr.bf16.mxu1 (!%p190_p2), %v1596_v23 }
   0xb   : > { %1446 = vmatpush3.bf16.msra.mxu0 (!%p190_p2), %v1583_v3  ;;  %v1598_v25 = vld [vmem:[%s2291_s2 + $0x10] sm:$0xff] (!%p190_p2)   ;;  %1524 = vmatpush3.bf16.msra.mxu1 (!%p190_p2), %v1596_v23  ;;  %v1599_v3 = vld [vmem:[%s2291_s2 + $0x18] sm:$0xff] (!%p190_p2)  }
   0xc   : > { %1447 = vmatprep.subr.bf16.mxu0 (!%p190_p2), %v1584_v4  ;;  %1525 = vmatprep.subr.bf16.mxu1 (!%p190_p2), %v1597_v24  ;;  %v1600_v4 = vld [vmem:[%s2291_s2 + $0x20] sm:$0xff] (!%p190_p2)   ;;  %v1963_v23 = vld [vmem:[%s2292_s3 + $0x50] ss:$8 sps:$4 sm:$0xff] (!%p190_p2)  }
   0xd   : > { %s2296_s22 = smov (!%p219_p3, %s1392_s22), 63 }
   0xe   : > { %s1442_s10 = sshll.u32 %s2296_s22, 4  ;;  %s1396_s21 = sshll.u32 %s2296_s22, 3 }
   0xf   : > { %1448 = vmatpush3.bf16.msra.mxu0 %v1585_v5  ;;  %s1789_s17 = scalar_lea.vmem %s2289_s0, %s1442_s10  ;;  %1526 = vmatpush3.bf16.msra.mxu1 %v1597_v24  ;;  %v1601_v5 = vld [vmem:[%s2291_s2 + $0x28] sm:$0xff]  }
  0x10   : > { %1449 = vmatprep.subr.bf16.mxu0 %v1586_v6  ;;  %v1798_v11 = vld [vmem:[%s1789_s17 + $0x8] sm:$0xff]  ;;  %v235_v12 = vld [vmem:[%s1789_s17 + $0x18] sm:$0xff]  ;;  %v1818_v19 = vld [vmem:[%s1789_s17] sm:$0xff]  ;;  %1527 = vmatprep.subr.bf16.mxu1 %v1598_v25 }
  0x11   : > { %v269_v13 = vpack.c.bf16 %v235_v12, %v1798_v11  ;;  %v1821_v20 = vld [vmem:[%s1789_s17 + $0x10] sm:$0xff]  ;;  %v1824_v21 = vld [vmem:[%s1789_s17 + $0x28] sm:$0xff]  ;;  %v239_v22 = vld [vmem:[%s1789_s17 + $0x38] sm:$0xff] }
  0x12   : > { %v268_v26 = vpack.c.bf16 %v1821_v20, %v1818_v19  ;;  %v271_v27 = vpack.c.bf16 %v239_v22, %v1824_v21  ;;  %v1840_v28 = vld [vmem:[%s1789_s17 + $0x20] sm:$0xff]  ;;  %v1843_v29 = vld [vmem:[%s1789_s17 + $0x30] sm:$0xff]  ;;  %v1846_v30 = vld [vmem:[%s1789_s17 + $0x48] sm:$0xff] }
  0x13   : > { %1450 = vmatpush3.bf16.msra.mxu0 %v1587_v7  ;;  %448 = vmatprep.mubr.bf16.mxu0 %v269_v13  ;;  %v1849_v31 = vld [vmem:[%s1789_s17 + $0x58] sm:$0xff]  ;;  %v270_v32 = vpack.c.bf16 %v1843_v29, %v1840_v28  ;;  %v1856_v34 = vld [vmem:[%s1789_s17 + $0x40] sm:$0xff]  ;;  %v1859_v35 = vld [vmem:[%s1789_s17 + $0x50] sm:$0xff] }
  0x14   : > { %1451 = vmatprep.subr.bf16.mxu0 %v1588_v8  ;;  %1528 = vmatpush3.bf16.msra.mxu1 %v1598_v25  ;;  %v273_v33 = vpack.c.bf16 %v1849_v31, %v1846_v30  ;;  %v1862_v36 = vld [vmem:[%s1789_s17 + $0x68] sm:$0xff]  ;;  %v1865_v37 = vld [vmem:[%s1789_s17 + $0x78] sm:$0xff]  ;;  %v272_v38 = vpack.c.bf16 %v1859_v35, %v1856_v34  ;;  %v1872_v40 = vld [vmem:[%s1789_s17 + $0x60] sm:$0xff] }
  0x15   : > { %v275_v39 = vpack.c.bf16 %v1865_v37, %v1862_v36  ;;  %v1875_v41 = vld [vmem:[%s1789_s17 + $0x70] sm:$0xff]  ;;  %v249_v42 = vld [vmem:[%s1789_s17 + $0x88] sm:$0xff]  ;;  %v251_v43 = vld [vmem:[%s1789_s17 + $0x98] sm:$0xff]  ;;  %1529 = vmatprep.subr.bf16.mxu1 %v1599_v3 }
  0x16   : > { %v274_v44 = vpack.c.bf16 %v1875_v41, %v1872_v40  ;;  %v277_v45 = vpack.c.bf16 %v251_v43, %v249_v42  ;;  %v1882_v46 = vld [vmem:[%s1789_s17 + $0x80] sm:$0xff]  ;;  %v250_v47 = vld [vmem:[%s1789_s17 + $0x90] sm:$0xff]  ;;  %v253_v48 = vld [vmem:[%s1789_s17 + $0xa8] sm:$0xff] }
  0x17   : > { %1452 = vmatpush3.bf16.msra.mxu0 %v1589_v9  ;;  %v255_v49 = vld [vmem:[%s1789_s17 + $0xb8] sm:$0xff]  ;;  %v276_v50 = vpack.c.bf16 %v250_v47, %v1882_v46  ;;  %v252_v52 = vld [vmem:[%s1789_s17 + $0xa0] sm:$0xff]  ;;  %v254_v53 = vld [vmem:[%s1789_s17 + $0xb0] sm:$0xff] }
  0x18   : > { %1453 = vmatprep.subr.bf16.mxu0 %v1590_v10  ;;  %v279_v51 = vpack.c.bf16 %v255_v49, %v253_v48  ;;  %v257_v54 = vld [vmem:[%s1789_s17 + $0xc8] sm:$0xff]  ;;  %v259_v55 = vld [vmem:[%s1789_s17 + $0xd8] sm:$0xff]  ;;  %v278_v56 = vpack.c.bf16 %v254_v53, %v252_v52  ;;  %v256_v58 = vld [vmem:[%s1789_s17 + $0xc0] sm:$0xff]  ;;  %1530 = vmatpush3.bf16.msra.mxu1 %v1599_v3 }
  0x19   : > { %v281_v57 = vpack.c.bf16 %v259_v55, %v257_v54  ;;  %v258_v59 = vld [vmem:[%s1789_s17 + $0xd0] sm:$0xff]  ;;  %v261_v60 = vld [vmem:[%s1789_s17 + $0xe8] sm:$0xff]  ;;  %v263_v61 = vld [vmem:[%s1789_s17 + $0xf8] sm:$0xff]  ;;  %1531 = vmatprep.subr.bf16.mxu1 %v1600_v4 }
  0x1a   : > { %v280_v62 = vpack.c.bf16 %v258_v59, %v256_v58  ;;  %v283_v63 = vpack.c.bf16 %v263_v61, %v261_v60  ;;  %v260_v0 = vld [vmem:[%s1789_s17 + $0xe0] sm:$0xff]  ;;  %v262_v1 = vld [vmem:[%s1789_s17 + $0xf0] sm:$0xff]  ;;  %v1603_v7 = vld [vmem:[%s2291_s2 + $0x38] sm:$0xff]  }
  0x1b   : > { %1454 = vmatpush3.bf16.msra.mxu0 %v1591_v14  ;;  %v282_v2 = vpack.c.bf16 %v262_v1, %v260_v0  ;;  %v1602_v6 = vld [vmem:[%s2291_s2 + $0x30] sm:$0xff]   ;;  %v1604_v8 = vld [vmem:[%s2292_s3] ss:$8 sps:$4 sm:$0xff]   ;;  %v1606_v9 = vld [vmem:[%s2292_s3 + $0x4] ss:$8 sps:$4 sm:$0xff]  }
  0x1c   : > { %1455 = vmatprep.subr.bf16.mxu0 %v1592_v15  ;;  %1532 = vmatpush3.bf16.msra.mxu1 %v1600_v4  ;;  %v1609_v10 = vld [vmem:[%s2292_s3 + $0x14] ss:$8 sps:$4 sm:$0xff]   ;;  %v1607_v12 = vld [vmem:[%s2292_s3 + $0x10] ss:$8 sps:$4 sm:$0xff]   ;;  %v1612_v13 = vld [vmem:[%s2292_s3 + $0x24] ss:$8 sps:$4 sm:$0xff]  }
  0x1d   : > { %1533 = vmatprep.subr.bf16.mxu1 %v1601_v5  ;;  %v1610_v14 = vld [vmem:[%s2292_s3 + $0x20] ss:$8 sps:$4 sm:$0xff]   ;;  %v1934_v15 = vld [vmem:[%s2292_s3 + $0x34] ss:$8 sps:$4 sm:$0xff]  }
  0x1e   : > { %v1957_v22 = vld [vmem:[%s2292_s3 + $0x54] ss:$8 sps:$4 sm:$0xff]  }
  0x1f   : > { %1456 = vmatpush3.bf16.msra.mxu0 %v1593_v16  ;;  %v1939_v16 = vld [vmem:[%s2292_s3 + $0x30] ss:$8 sps:$4 sm:$0xff]  }
  0x20   : > { %1457 = vmatprep.subr.bf16.mxu0 %v1594_v17  ;;  %1534 = vmatpush3.bf16.msra.mxu1 %v1601_v5  ;;  %v1945_v17 = vld [vmem:[%s2292_s3 + $0x44] ss:$8 sps:$4 sm:$0xff]  }
  0x21   : > { %1535 = vmatprep.subr.bf16.mxu1 %v1602_v6 }
  0x23   : > { %1458 = vmatpush3.bf16.msra.mxu0 %v1595_v18  ;;  %v1951_v18 = vld [vmem:[%s2292_s3 + $0x40] ss:$8 sps:$4 sm:$0xff]  }
  0x24   : > { %1536 = vmatpush3.bf16.msra.mxu1 %v1602_v6  ;;  %833 = vmatprep.subr.bf16.mxu0 %v1606_v9 }
  0x25   : > { %1537 = vmatprep.subr.bf16.mxu1 %v1603_v7 }
  0x26   : > { %449 = vmatmul.mubr.bf16.vlgmr.msra.gmra.mrb[0].mxu0 %v268_v26  ;;  %v1970_v26 = vld [vmem:[%s2293_s4] ss:$0 sm:$0xff] }
  0x27   : > { %456 = vmatprep.mubr.bf16.mxu0 %v271_v27  ;;  %834 = vmatpush1.bf16.msra.mxu0 %v1604_v8 }
  0x28   : > { %1538 = vmatpush3.bf16.msra.mxu1 %v1603_v7  ;;  %835 = vmatprep.subr.bf16.mxu0 %v1609_v10 }
  0x29   : > { %1555 = vmatprep.subr.bf16.mxu1 %v1606_v9 }
  0x2b   : > { %836 = vmatpush1.bf16.msra.mxu0 %v1607_v12 }
  0x2c   : > { %837 = vmatprep.subr.bf16.mxu0 %v1612_v13 }
  0x2e   : > { %457 = vmatmul.mubr.bf16.gmra.mrb[4].mxu0 %v270_v32 }
  0x2f   : > { %464 = vmatprep.mubr.bf16.mxu0 %v273_v33  ;;  %838 = vmatpush1.bf16.msra.mxu0 %v1610_v14 }
  0x30   : > { %839 = vmatprep.subr.bf16.mxu0 %v1934_v15 }
  0x33   : > { %840 = vmatpush1.bf16.msra.mxu0 %v1939_v16 }
  0x34   : > { %841 = vmatprep.subr.bf16.mxu0 %v1945_v17 }
  0x36   : > { %465 = vmatmul.mubr.bf16.gmra.mrb[8].mxu0 %v272_v38 }
  0x37   : > { %472 = vmatprep.mubr.bf16.mxu0 %v275_v39  ;;  %842 = vmatpush1.bf16.msra.mxu0 %v1951_v18 }
  0x38   : > { %843 = vmatprep.subr.bf16.mxu0 %v1957_v22 }
  0x3b   : > { %844 = vmatpush1.bf16.msra.mxu0 %v1963_v23 }
  0x3e   : > { %473 = vmatmul.mubr.bf16.gmra.mrb[12].mxu0 %v274_v44 }
  0x3f   : > { %480 = vmatprep.mubr.bf16.mxu0 %v277_v45 }
  0x46   : > { %481 = vmatmul.mubr.bf16.gmra.mrb[16].mxu0 %v276_v50 }
  0x47   : > { %488 = vmatprep.mubr.bf16.mxu0 %v279_v51 }
  0x4e   : > { %489 = vmatmul.mubr.bf16.gmra.mrb[20].mxu0 %v278_v56 }
  0x4f   : > { %496 = vmatprep.mubr.bf16.mxu0 %v281_v57 }
  0x56   : > { %497 = vmatmul.mubr.bf16.gmra.mrb[24].mxu0 %v280_v62 }
  0x57   : > { %504 = vmatprep.mubr.bf16.mxu0 %v283_v63 }
  0x5e   : > { %505 = vmatmul.mubr.bf16.gmra.mrb[28].mxu0 %v282_v2 }
  0xf9   : > { %v1459_v24 = vpop.f32.mrb[0].mxu0 }
  0xfa   : > { %v1460_v25 = vpop.f32.mrb[1].mxu0 }
  0xfb   : > { %v1461_v27 = vadd.f32 %v1460_v25, %v1459_v24  ;;  %v1462_v32 = vpop.f32.mrb[2].mxu0 }
  0xfc   : > { %v1463_v33 = vpop.f32.mrb[3].mxu0 }
  0xfd   : > { %v1464_v38 = vadd.f32 %v1463_v33, %v1462_v32  ;;  %v451_v39 = vadd.f32 %v1461_v27, %v1970_v26 }
  0xff   : > { %v454_v42 = vadd.f32 %v1464_v38, %v1970_v26  ;;  %v513_v44 = vmax.f32 %v451_v39, 0.0 }
 0x101   : > { %v1465_v43 = vpop.f32.mrb[4].mxu0  ;;  %v514_v45 = vmax.f32 %v454_v42, 0.0 }
 0x102   : > { %v1466_v47 = vpop.f32.mrb[5].mxu0 }
 0x103   : > { %v1467_v48 = vadd.f32 %v1466_v47, %v1465_v43  ;;  %v1468_v49 = vpop.f32.mrb[6].mxu0  ;;  %v529_v50 = vpack.c.bf16 %v514_v45, %v513_v44 }
 0x104   : > { %v1469_v51 = vpop.f32.mrb[7].mxu0 }
 0x105   : > { %v459_v52 = vadd.f32 %v1467_v48, %v1970_v26  ;;  %v1470_v53 = vadd.f32 %v1469_v51, %v1468_v49  ;;  %1539 = vmatprep.mubr.bf16.mxu1 %v529_v50 }
 0x107   : > { %v462_v54 = vadd.f32 %v1470_v53, %v1970_v26  ;;  %v515_v55 = vmax.f32 %v459_v52, 0.0 }
 0x109   : > { %v516_v56 = vmax.f32 %v462_v54, 0.0  ;;  %v1471_v57 = vpop.f32.mrb[8].mxu0 }
 0x10a   : > { %v1472_v58 = vpop.f32.mrb[9].mxu0 }
 0x10b   : > { %v1473_v59 = vadd.f32 %v1472_v58, %v1471_v57  ;;  %v1474_v60 = vpop.f32.mrb[10].mxu0  ;;  %v530_v61 = vpack.c.bf16 %v516_v56, %v515_v55 }
 0x10c   : > { %v1475_v62 = vpop.f32.mrb[11].mxu0 }
 0x10d   : > { %v467_v63 = vadd.f32 %v1473_v59, %v1970_v26  ;;  %v1476_v0 = vadd.f32 %v1475_v62, %v1474_v60  ;;  %1540 = vmatmul.mubr.bf16.vlgmr.msra.gmra.mrb[0].mxu1 %v530_v61 }
 0x10e   : > { %1563 = vmatpush1.bf16.msra.mxu1 %v1604_v8 }
 0x10f   : > { %v470_v1 = vadd.f32 %v1476_v0, %v1970_v26  ;;  %1556 = vmatprep.subr.bf16.mxu1 %v1609_v10  ;;  %v517_v2 = vmax.f32 %v467_v63, 0.0 }
 0x111   : > { %v518_v3 = vmax.f32 %v470_v1, 0.0  ;;  %v1477_v4 = vpop.f32.mrb[12].mxu0 }
 0x112   : > { %v1478_v5 = vpop.f32.mrb[13].mxu0  ;;  %1564 = vmatpush1.bf16.msra.mxu1 %v1607_v12 }
 0x113   : > { %v1479_v6 = vadd.f32 %v1478_v5, %v1477_v4  ;;  %v1480_v7 = vpop.f32.mrb[14].mxu0  ;;  %v531_v9 = vpack.c.bf16 %v518_v3, %v517_v2  ;;  %1557 = vmatprep.subr.bf16.mxu1 %v1612_v13 }
 0x114   : > { %v1481_v24 = vpop.f32.mrb[15].mxu0 }
 0x115   : > { %v475_v25 = vadd.f32 %v1479_v6, %v1970_v26  ;;  %v1482_v27 = vadd.f32 %v1481_v24, %v1480_v7  ;;  %1543 = vmatprep.mubr.bf16.mxu1 %v531_v9 }
 0x116   : > { %1565 = vmatpush1.bf16.msra.mxu1 %v1610_v14 }
 0x117   : > { %v478_v8 = vadd.f32 %v1482_v27, %v1970_v26  ;;  %1558 = vmatprep.subr.bf16.mxu1 %v1934_v15  ;;  %v519_v10 = vmax.f32 %v475_v25, 0.0 }
 0x119   : > { %v520_v32 = vmax.f32 %v478_v8, 0.0  ;;  %v1483_v33 = vpop.f32.mrb[16].mxu0  ;;  %v1624_v8 = vld [vmem:[%s2292_s3 + $0x64] ss:$8 sps:$4 sm:$0xff]  }
 0x11a   : > { %v1484_v38 = vpop.f32.mrb[17].mxu0  ;;  %1566 = vmatpush1.bf16.msra.mxu1 %v1939_v16  ;;  %845 = vmatprep.subr.bf16.mxu0 %v1624_v8 }
 0x11b   : > { %v1485_v12 = vadd.f32 %v1484_v38, %v1483_v33  ;;  %v1486_v39 = vpop.f32.mrb[18].mxu0  ;;  %v532_v42 = vpack.c.bf16 %v520_v32, %v519_v10  ;;  %1559 = vmatprep.subr.bf16.mxu1 %v1945_v17  ;;  %v1622_v10 = vld [vmem:[%s2292_s3 + $0x60] ss:$8 sps:$4 sm:$0xff]   ;;  %v1625_v32 = vld [vmem:[%s2292_s3 + $0x70] ss:$8 sps:$4 sm:$0xff]   ;;  %v1717_v33 = vmov 0  }
 0x11c   : > { %v1487_v13 = vpop.f32.mrb[19].mxu0  ;;  %846 = vmatpush1.bf16.msra.mxu0 %v1622_v10  ;;  %865 = vmatprep.mubr.bf16.mxu0 %v1717_v33  ;;  %v1415_v38 = vld [vmem:[%s2293_s4 + $0x1] ss:$0 sm:$0xff] }
 0x11d   : > { %v483_v43 = vadd.f32 %v1485_v12, %v1970_v26  ;;  %v1488_v44 = vadd.f32 %v1487_v13, %v1486_v39  ;;  %1544 = vmatmul.mubr.bf16.gmra.mrb[4].mxu1 %v532_v42 }
 0x11e   : > { %1567 = vmatpush1.bf16.msra.mxu1 %v1951_v18 }
 0x11f   : > { %v486_v14 = vadd.f32 %v1488_v44, %v1970_v26  ;;  %1560 = vmatprep.subr.bf16.mxu1 %v1957_v22  ;;  %v521_v15 = vmax.f32 %v483_v43, 0.0 }
 0x121   : > { %v522_v45 = vmax.f32 %v486_v14, 0.0  ;;  %v1489_v47 = vpop.f32.mrb[20].mxu0 }
 0x122   : > { %v1490_v16 = vpop.f32.mrb[21].mxu0  ;;  %1568 = vmatpush1.bf16.msra.mxu1 %v1963_v23 }
 0x123   : > { %v1491_v48 = vadd.f32 %v1490_v16, %v1489_v47  ;;  %v1492_v49 = vpop.f32.mrb[22].mxu0  ;;  %v533_v17 = vpack.c.bf16 %v522_v45, %v521_v15  ;;  %1561 = vmatprep.subr.bf16.mxu1 %v1624_v8 }
 0x124   : > { %v1493_v50 = vpop.f32.mrb[23].mxu0 }
 0x125   : > { %v491_v51 = vadd.f32 %v1491_v48, %v1970_v26  ;;  %v1494_v52 = vadd.f32 %v1493_v50, %v1492_v49  ;;  %1547 = vmatprep.mubr.bf16.mxu1 %v533_v17 }
 0x126   : > { %1569 = vmatpush1.bf16.msra.mxu1 %v1622_v10 }
 0x127   : > { %v494_v18 = vadd.f32 %v1494_v52, %v1970_v26  ;;  %v523_v53 = vmax.f32 %v491_v51, 0.0 }
 0x129   : > { %v524_v54 = vmax.f32 %v494_v18, 0.0  ;;  %v1495_v55 = vpop.f32.mrb[24].mxu0 }
 0x12a   : > { %v1496_v22 = vpop.f32.mrb[25].mxu0 }
 0x12b   : > { %v1497_v56 = vadd.f32 %v1496_v22, %v1495_v55  ;;  %v1498_v57 = vpop.f32.mrb[26].mxu0  ;;  %v534_v58 = vpack.c.bf16 %v524_v54, %v523_v53 }
 0x12c   : > { %v1499_v59 = vpop.f32.mrb[27].mxu0 }
 0x12d   : > { %v499_v23 = vadd.f32 %v1497_v56, %v1970_v26  ;;  %v1500_v60 = vadd.f32 %v1499_v59, %v1498_v57  ;;  %1548 = vmatmul.mubr.bf16.gmra.mrb[8].mxu1 %v534_v58 }
 0x12f   : > { %v502_v61 = vadd.f32 %v1500_v60, %v1970_v26  ;;  %v525_v62 = vmax.f32 %v499_v23, 0.0 }
 0x131   : > { %v526_v63 = vmax.f32 %v502_v61, 0.0  ;;  %v1501_v0 = vpop.f32.mrb[28].mxu0 }
 0x132   : > { %v1502_v1 = vpop.f32.mrb[29].mxu0 }
 0x133   : > { %v1503_v2 = vadd.f32 %v1502_v1, %v1501_v0  ;;  %v1504_v3 = vpop.f32.mrb[30].mxu0  ;;  %v535_v4 = vpack.c.bf16 %v526_v63, %v525_v62 }
 0x134   : > { %v1505_v5 = vpop.f32.mrb[31].mxu0 }
 0x135   : > { %v507_v6 = vadd.f32 %v1503_v2, %v1970_v26  ;;  %v1506_v7 = vadd.f32 %v1505_v5, %v1504_v3  ;;  %1551 = vmatprep.mubr.bf16.mxu1 %v535_v4 }
 0x137   : > { %v510_v9 = vadd.f32 %v1506_v7, %v1970_v26  ;;  %v527_v24 = vmax.f32 %v507_v6, 0.0  ;;  %v1627_v26 = vld [vmem:[%s2292_s3 + $0x74] ss:$8 sps:$4 sm:$0xff]  }
 0x138   : > { %847 = vmatprep.subr.bf16.mxu0 %v1627_v26  ;;  %1562 = vmatprep.subr.bf16.mxu1 %v1627_v26 }
 0x139   : > { %v528_v25 = vmax.f32 %v510_v9, 0.0  ;;  %848 = vmatpush1.bf16.msra.mxu0 %v1625_v32  ;;  %1570 = vmatpush1.bf16.msra.mxu1 %v1625_v32 }
 0x13b   : > { %v536_v27 = vpack.c.bf16 %v528_v25, %v527_v24 }
 0x13d   : > { %1552 = vmatmul.mubr.bf16.gmra.mrb[12].mxu1 %v536_v27 }
 0x13e   : > { %885 = vmatprep.mubr.bf16.mxu1 %v1717_v33 }
 0x1e0   : > { %v1541_v12 = vpop.f32.mrb[0].mxu1 }
 0x1e1   : > { %v648_v39 = vadd.f32 %v1541_v12, %v1415_v38  ;;  %v639_v42 = vpop.f32.mrb[1].mxu1 }
 0x1e2   : > { %v640_v13 = vadd.f32 %v1415_v38, %v639_v42  ;;  %v1542_v43 = vpop.f32.mrb[2].mxu1 }
 0x1e3   : > { %v651_v44 = vadd.f32 %v1542_v43, %v1415_v38  ;;  %v642_v14 = vpop.f32.mrb[3].mxu1  ;;  %v704_v45 = vmax.f32 %v648_v39, 0.0 }
 0x1e4   : > { %v643_v15 = vadd.f32 %v1415_v38, %v642_v14  ;;  %v702_v16 = vmax.f32 %v640_v13, 0.0 }
 0x1e5   : > { %v705_v47 = vmax.f32 %v651_v44, 0.0 }
 0x1e6   : > { %v703_v48 = vmax.f32 %v643_v15, 0.0 }
 0x1e7   : > { %v719_v49 = vpack.c.bf16 %v705_v47, %v704_v45  ;;  %v743_v47 = vlaneseq }
 0x1e8   : > { %v718_v17 = vpack.c.bf16 %v703_v48, %v702_v16 }
 0x1e9   : > { %v744_v16 = vshrl.u32 %v743_v47, 7 }
 0x1ea   : > { %866 = vmatmul.mubr.bf16.vlgmr.msra.gmra.mrb[32].mxu0 %v718_v17 }
 0x1eb   : > { %875 = vmatprep.mubr.bf16.mxu0 %v1717_v33  ;;  %v745_v48 = vsub.s32 0, %v744_v16  ;;  %v749_v17 = vsub.s32 1, %v744_v16 }
 0x1f0   : > { %v1545_v50 = vpop.f32.mrb[4].mxu1 }
 0x1f1   : > { %v664_v51 = vadd.f32 %v1545_v50, %v1415_v38  ;;  %v655_v52 = vpop.f32.mrb[5].mxu1 }
 0x1f2   : > { %v656_v18 = vadd.f32 %v1415_v38, %v655_v52  ;;  %v1546_v53 = vpop.f32.mrb[6].mxu1  ;;  %876 = vmatmul.mubr.bf16.gmra.mrb[36].mxu0 %v719_v49  ;;  %v1397_v49 = vld [vmem:[%s2293_s4 + $0x2] ss:$4 sm:$0x3] }
 0x1f3   : > { %v667_v54 = vadd.f32 %v1546_v53, %v1415_v38  ;;  %v658_v55 = vpop.f32.mrb[7].mxu1  ;;  %v708_v56 = vmax.f32 %v664_v51, 0.0  ;;  %v2020_v50 = vrot.slane %v1397_v49, %v745_v48 }
 0x1f4   : > { %v659_v22 = vadd.f32 %v1415_v38, %v658_v55  ;;  %v706_v58 = vmax.f32 %v656_v18, 0.0 }
 0x1f5   : > { %v709_v57 = vmax.f32 %v667_v54, 0.0 }
 0x1f6   : > { %v707_v59 = vmax.f32 %v659_v22, 0.0 }
 0x1f7   : > { %v721_v23 = vpack.c.bf16 %v709_v57, %v708_v56 }
 0x1f8   : > { %v720_v60 = vpack.c.bf16 %v707_v59, %v706_v58 }
 0x1fa   : > { %886 = vmatmul.mubr.bf16.vlgmr.msra.gmra.mrb[16].mxu1 %v720_v60 }
 0x1fb   : > { %895 = vmatprep.mubr.bf16.mxu1 %v1717_v33 }
 0x200   : > { %v1549_v61 = vpop.f32.mrb[8].mxu1 }
 0x201   : > { %v680_v62 = vadd.f32 %v1549_v61, %v1415_v38  ;;  %v671_v63 = vpop.f32.mrb[9].mxu1 }
 0x202   : > { %v672_v0 = vadd.f32 %v1415_v38, %v671_v63  ;;  %v1550_v1 = vpop.f32.mrb[10].mxu1  ;;  %896 = vmatmul.mubr.bf16.gmra.mrb[20].mxu1 %v721_v23 }
 0x203   : > { %v683_v2 = vadd.f32 %v1550_v1, %v1415_v38  ;;  %v674_v3 = vpop.f32.mrb[11].mxu1  ;;  %905 = vmatprep.mubr.bf16.mxu1 %v1717_v33  ;;  %v712_v5 = vmax.f32 %v680_v62, 0.0 }
 0x204   : > { %v675_v4 = vadd.f32 %v1415_v38, %v674_v3  ;;  %v710_v7 = vmax.f32 %v672_v0, 0.0 }
 0x205   : > { %v713_v6 = vmax.f32 %v683_v2, 0.0 }
 0x206   : > { %v711_v9 = vmax.f32 %v675_v4, 0.0 }
 0x207   : > { %v723_v24 = vpack.c.bf16 %v713_v6, %v712_v5 }
 0x208   : > { %v722_v25 = vpack.c.bf16 %v711_v9, %v710_v7 }
 0x20a   : > { %906 = vmatmul.mubr.bf16.gmra.mrb[24].mxu1 %v722_v25 }
 0x20b   : > { %915 = vmatprep.mubr.bf16.mxu1 %v1717_v33 }
 0x210   : > { %v1553_v27 = vpop.f32.mrb[12].mxu1 }
 0x211   : > { %v696_v8 = vadd.f32 %v1553_v27, %v1415_v38  ;;  %v687_v10 = vpop.f32.mrb[13].mxu1 }
 0x212   : > { %v688_v26 = vadd.f32 %v1415_v38, %v687_v10  ;;  %v1554_v32 = vpop.f32.mrb[14].mxu1  ;;  %916 = vmatmul.mubr.bf16.gmra.mrb[28].mxu1 %v723_v24 }
 0x213   : > { %v699_v12 = vadd.f32 %v1554_v32, %v1415_v38  ;;  %v690_v39 = vpop.f32.mrb[15].mxu1  ;;  %925 = vmatprep.mubr.bf16.mxu1 %v1717_v33  ;;  %v716_v13 = vmax.f32 %v696_v8, 0.0 }
 0x214   : > { %v691_v42 = vadd.f32 %v1415_v38, %v690_v39  ;;  %v714_v44 = vmax.f32 %v688_v26, 0.0  ;;  %v2022_v38 = vrot.slane %v1397_v49, %v749_v17 }
 0x215   : > { %v717_v43 = vmax.f32 %v699_v12, 0.0 }
 0x216   : > { %v715_v14 = vmax.f32 %v691_v42, 0.0 }
 0x217   : > { %v725_v15 = vpack.c.bf16 %v717_v43, %v716_v13 }
 0x218   : > { %v724_v45 = vpack.c.bf16 %v715_v14, %v714_v44 }
 0x21a   : > { %926 = vmatmul.mubr.bf16.gmra.mrb[32].mxu1 %v724_v45 }
 0x21b   : > { %935 = vmatprep.mubr.bf16.mxu1 %v1717_v33 }
 0x222   : > { %936 = vmatmul.mubr.bf16.gmra.mrb[36].mxu1 %v725_v15 }
 0x2bd   : > { %v867_v51 = vpop.f32.mrb[32].mxu0 }
 0x2be   : > { %v2025_v52 = vadd.f32 %v867_v51, %v2020_v50  ;;  %v869_v18 = vpop.f32.mrb[33].mxu0 }
 0x2bf   : > { %v2028_v33 = vadd.f32 %v869_v18, %v2022_v38  ;;  %v871_v53 = vpop.f32.mrb[34].mxu0 }
 0x2c0   : > { %v2031_v54 = vadd.f32 %v871_v53, %v2020_v50  ;;  %v873_v55 = vpop.f32.mrb[35].mxu0  ;;  %v946_v22 = vmul.f32 %v2025_v52, %v2025_v52 }
 0x2c1   : > { %v2036_v56 = vadd.f32 %v873_v55, %v2022_v38  ;;  %v947_v57 = vmul.f32 %v2028_v33, %v2028_v33 }
 0x2c2   : > { %v948_v58 = vmul.f32 %v2031_v54, %v2031_v54 }
 0x2c3   : > { %v949_v59 = vmul.f32 %v2036_v56, %v2036_v56  ;;  %v978_v23 = vadd.f32 %v947_v57, %v946_v22 }
 0x2c5   : > { %v877_v60 = vpop.f32.mrb[36].mxu0  ;;  %979 = vadd.xlane.f32.xlu0 %v978_v23  ;;  %v981_v1 = vadd.f32 %v949_v59, %v948_v58 }
 0x2c6   : > { %v2045_v61 = vadd.f32 %v877_v60, %v2020_v50  ;;  %v879_v62 = vpop.f32.mrb[37].mxu0 }
 0x2c7   : > { %v2048_v63 = vadd.f32 %v879_v62, %v2022_v38  ;;  %v881_v0 = vpop.f32.mrb[38].mxu0 }
 0x2c8   : > { %v2051_v2 = vadd.f32 %v881_v0, %v2020_v50  ;;  %v883_v3 = vpop.f32.mrb[39].mxu0  ;;  %v950_v4 = vmul.f32 %v2045_v61, %v2045_v61 }
 0x2c9   : > { %v2056_v5 = vadd.f32 %v883_v3, %v2022_v38  ;;  %982 = vadd.xlane.f32.xlu0 %v981_v1  ;;  %v951_v6 = vmul.f32 %v2048_v63, %v2048_v63 }
 0x2ca   : > { %v952_v7 = vmul.f32 %v2051_v2, %v2051_v2 }
 0x2cb   : > { %v953_v9 = vmul.f32 %v2056_v5, %v2056_v5  ;;  %v984_v24 = vadd.f32 %v951_v6, %v950_v4 }
 0x2cd   : > { %v887_v25 = vpop.f32.mrb[16].mxu1  ;;  %985 = vadd.xlane.f32.xlu1 %v984_v24  ;;  %v987_v32 = vadd.f32 %v953_v9, %v952_v7 }
 0x2ce   : > { %v2065_v27 = vadd.f32 %v887_v25, %v2020_v50  ;;  %v889_v8 = vpop.f32.mrb[17].mxu1 }
 0x2cf   : > { %v2068_v10 = vadd.f32 %v889_v8, %v2022_v38  ;;  %v891_v26 = vpop.f32.mrb[18].mxu1 }
 0x2d0   : > { %v954_v12 = vmul.f32 %v2065_v27, %v2065_v27  ;;  %v2073_v39 = vadd.f32 %v891_v26, %v2020_v50  ;;  %v893_v42 = vpop.f32.mrb[19].mxu1 }
 0x2d1   : > { %v955_v13 = vmul.f32 %v2068_v10, %v2068_v10  ;;  %v2078_v43 = vadd.f32 %v893_v42, %v2022_v38  ;;  %988 = vadd.xlane.f32.xlu1 %v987_v32 }
 0x2d2   : > { %v956_v44 = vmul.f32 %v2073_v39, %v2073_v39 }
 0x2d3   : > { %v957_v14 = vmul.f32 %v2078_v43, %v2078_v43  ;;  %v990_v15 = vadd.f32 %v955_v13, %v954_v12 }
 0x2d5   : > { %v897_v45 = vpop.f32.mrb[20].mxu1  ;;  %991 = vadd.xlane.f32.xlu0 %v990_v15  ;;  %v993_v47 = vadd.f32 %v957_v14, %v956_v44 }
 0x2d6   : > { %v2085_v16 = vadd.f32 %v897_v45, %v2020_v50  ;;  %v899_v48 = vpop.f32.mrb[21].mxu1 }
 0x2d7   : > { %v2088_v49 = vadd.f32 %v899_v48, %v2022_v38  ;;  %v901_v17 = vpop.f32.mrb[22].mxu1  ;;  %994 = vadd.xlane.f32.xlu1 %v993_v47 }
 0x2d8   : > { %v958_v51 = vmul.f32 %v2085_v16, %v2085_v16  ;;  %v2093_v18 = vadd.f32 %v901_v17, %v2020_v50  ;;  %v903_v53 = vpop.f32.mrb[23].mxu1 }
 0x2d9   : > { %v959_v55 = vmul.f32 %v2088_v49, %v2088_v49  ;;  %v2098_v22 = vadd.f32 %v903_v53, %v2022_v38 }
 0x2da   : > { %v960_v57 = vmul.f32 %v2093_v18, %v2093_v18 }
 0x2db   : > { %v961_v58 = vmul.f32 %v2098_v22, %v2098_v22  ;;  %v996_v59 = vadd.f32 %v959_v55, %v958_v51 }
 0x2dd   : > { %v907_v23 = vpop.f32.mrb[24].mxu1  ;;  %997 = vadd.xlane.f32.xlu0 %v996_v59  ;;  %v999_v60 = vadd.f32 %v961_v58, %v960_v57 }
 0x2de   : > { %v2105_v62 = vadd.f32 %v907_v23, %v2020_v50  ;;  %v909_v0 = vpop.f32.mrb[25].mxu1 }
 0x2df   : > { %v2108_v1 = vadd.f32 %v909_v0, %v2022_v38  ;;  %v911_v3 = vpop.f32.mrb[26].mxu1  ;;  %1000 = vadd.xlane.f32.xlu1 %v999_v60 }
 0x2e0   : > { %v962_v4 = vmul.f32 %v2105_v62, %v2105_v62  ;;  %v2113_v6 = vadd.f32 %v911_v3, %v2020_v50  ;;  %v913_v7 = vpop.f32.mrb[27].mxu1 }
 0x2e1   : > { %v963_v9 = vmul.f32 %v2108_v1, %v2108_v1  ;;  %v2118_v24 = vadd.f32 %v913_v7, %v2022_v38 }
 0x2e2   : > { %v964_v25 = vmul.f32 %v2113_v6, %v2113_v6 }
 0x2e3   : > { %v965_v8 = vmul.f32 %v2118_v24, %v2118_v24  ;;  %v1002_v26 = vadd.f32 %v963_v9, %v962_v4 }
 0x2e5   : > { %v917_v32 = vpop.f32.mrb[28].mxu1  ;;  %1003 = vadd.xlane.f32.xlu0 %v1002_v26  ;;  %v1005_v12 = vadd.f32 %v965_v8, %v964_v25 }
 0x2e6   : > { %v2125_v42 = vadd.f32 %v917_v32, %v2020_v50  ;;  %v919_v13 = vpop.f32.mrb[29].mxu1 }
 0x2e7   : > { %v2128_v44 = vadd.f32 %v919_v13, %v2022_v38  ;;  %v921_v14 = vpop.f32.mrb[30].mxu1  ;;  %1006 = vadd.xlane.f32.xlu1 %v1005_v12 }
 0x2e8   : > { %v966_v15 = vmul.f32 %v2125_v42, %v2125_v42  ;;  %v2133_v45 = vadd.f32 %v921_v14, %v2020_v50  ;;  %v923_v47 = vpop.f32.mrb[31].mxu1 }
 0x2e9   : > { %v967_v48 = vmul.f32 %v2128_v44, %v2128_v44  ;;  %v2138_v17 = vadd.f32 %v923_v47, %v2022_v38 }
 0x2ea   : > { %v968_v51 = vmul.f32 %v2133_v45, %v2133_v45 }
 0x2eb   : > { %v969_v53 = vmul.f32 %v2138_v17, %v2138_v17  ;;  %v1008_v55 = vadd.f32 %v967_v48, %v966_v15 }
 0x2ed   : > { %v927_v57 = vpop.f32.mrb[32].mxu1  ;;  %1009 = vadd.xlane.f32.xlu0 %v1008_v55  ;;  %v1011_v58 = vadd.f32 %v969_v53, %v968_v51 }
 0x2ee   : > { %v2145_v59 = vadd.f32 %v927_v57, %v2020_v50  ;;  %v929_v23 = vpop.f32.mrb[33].mxu1 }
 0x2ef   : > { %v2148_v60 = vadd.f32 %v929_v23, %v2022_v38  ;;  %v931_v0 = vpop.f32.mrb[34].mxu1  ;;  %1012 = vadd.xlane.f32.xlu1 %v1011_v58 }
 0x2f0   : > { %v970_v3 = vmul.f32 %v2145_v59, %v2145_v59  ;;  %v2153_v4 = vadd.f32 %v931_v0, %v2020_v50  ;;  %v933_v7 = vpop.f32.mrb[35].mxu1 }
 0x2f1   : > { %v971_v9 = vmul.f32 %v2148_v60, %v2148_v60  ;;  %v2158_v25 = vadd.f32 %v933_v7, %v2022_v38 }
 0x2f2   : > { %v972_v8 = vmul.f32 %v2153_v4, %v2153_v4 }
 0x2f3   : > { %v973_v26 = vmul.f32 %v2158_v25, %v2158_v25  ;;  %v1014_v32 = vadd.f32 %v971_v9, %v970_v3 }
 0x2f5   : > { %v937_v12 = vpop.f32.mrb[36].mxu1  ;;  %1015 = vadd.xlane.f32.xlu0 %v1014_v32  ;;  %v1017_v13 = vadd.f32 %v973_v26, %v972_v8 }
 0x2f6   : > { %v2165_v14 = vadd.f32 %v937_v12, %v2020_v50  ;;  %v939_v15 = vpop.f32.mrb[37].mxu1 }
 0x2f7   : > { %v2168_v47 = vadd.f32 %v939_v15, %v2022_v38  ;;  %v941_v48 = vpop.f32.mrb[38].mxu1  ;;  %1018 = vadd.xlane.f32.xlu1 %v1017_v13 }
 0x2f8   : > { %v974_v51 = vmul.f32 %v2165_v14, %v2165_v14  ;;  %v2173_v53 = vadd.f32 %v941_v48, %v2020_v50  ;;  %v943_v55 = vpop.f32.mrb[39].mxu1 }
 0x2f9   : > { %v975_v57 = vmul.f32 %v2168_v47, %v2168_v47  ;;  %v2178_v58 = vadd.f32 %v943_v55, %v2022_v38 }
 0x2fa   : > { %v976_v23 = vmul.f32 %v2173_v53, %v2173_v53 }
 0x2fb   : > { %v977_v0 = vmul.f32 %v2178_v58, %v2178_v58  ;;  %v1020_v3 = vadd.f32 %v975_v57, %v974_v51 }
 0x2fd   : > { %1021 = vadd.xlane.f32.xlu0 %v1020_v3  ;;  %v1023_v7 = vadd.f32 %v977_v0, %v976_v23 }
 0x2ff   : > { %1024 = vadd.xlane.f32.xlu1 %v1023_v7 }
 0x352   : > { %v980_v9 = vpop.xlane.xlu0 %979 }
 0x353   : > { %v1026_v50 = vmax.f32 %v980_v9, 1e-24 }
 0x355   : > { %1628 = vrsqrt.f32 %v1026_v50 }
 0x356   : > { %v983_v8 = vpop.xlane.xlu0 %982 }
 0x357   : > { %v1027_v26 = vmax.f32 %v983_v8, 1e-24 }
 0x359   : > { %1630 = vrsqrt.f32 %v1027_v26 }
 0x35a   : > { %v986_v32 = vpop.xlane.xlu1 %985 }
 0x35b   : > { %v1028_v12 = vmax.f32 %v986_v32, 1e-24 }
 0x35d   : > { %1632 = vrsqrt.f32 %v1028_v12  ;;  %v1692_v12 = vld [vmem:[%s1789_s17 + $0x18] sm:$0xff] }
 0x35e   : > { %v989_v38 = vpop.xlane.xlu1 %988 }
 0x35f   : > { %v1629_v13 = vpop.eup %1628  ;;  %v1029_v15 = vmax.f32 %v989_v38, 1e-24 }
 0x360   : > { %v1058_v48 = vmul.f32 %v1629_v13, %v2025_v52  ;;  %v1059_v55 = vmul.f32 %v1629_v13, %v2028_v33 }
 0x361   : > { %1634 = vrsqrt.f32 %v1029_v15 }
 0x362   : > { %v992_v51 = vpop.xlane.xlu0 %991  ;;  %v1090_v57 = vsub.f32 %v1058_v48, %v1818_v19  ;;  %v1091_v23 = vsub.f32 %v1059_v55, %v1798_v11 }
 0x363   : > { %v1631_v0 = vpop.eup %1630  ;;  %v1030_v3 = vmax.f32 %v992_v51, 1e-24 }
 0x364   : > { %v995_v7 = vpop.xlane.xlu1 %994  ;;  %v1122_v9 = vmul.f32 %v1090_v57, %v1090_v57  ;;  %v1123_v50 = vmul.f32 %v1091_v23, %v1091_v23  ;;  %v1060_v8 = vmul.f32 %v1631_v0, %v2031_v54  ;;  %v1061_v26 = vmul.f32 %v1631_v0, %v2036_v56 }
 0x365   : > { %1636 = vrsqrt.f32 %v1030_v3  ;;  %v1031_v52 = vmax.f32 %v995_v7, 1e-24 }
 0x366   : > { %v1154_v32 = vadd.f32 %v1123_v50, %v1122_v9  ;;  %v1092_v33 = vsub.f32 %v1060_v8, %v1821_v20  ;;  %v1093_v38 = vsub.f32 %v1061_v26, %v1692_v12  ;;  %v1693_v8 = vld [vmem:[%s1789_s17 + $0x38] sm:$0xff] }
 0x367   : > { %v1633_v13 = vpop.eup %1632  ;;  %1638 = vrsqrt.f32 %v1031_v52 }
 0x368   : > { %1155 = vadd.xlane.f32.xlu0 %v1154_v32  ;;  %v1124_v11 = vmul.f32 %v1092_v33, %v1092_v33  ;;  %v1125_v19 = vmul.f32 %v1093_v38, %v1093_v38  ;;  %v1062_v15 = vmul.f32 %v1633_v13, %v2045_v61  ;;  %v1063_v48 = vmul.f32 %v1633_v13, %v2048_v63 }
 0x36a   : > { %v998_v55 = vpop.xlane.xlu0 %997  ;;  %v1157_v54 = vadd.f32 %v1125_v19, %v1124_v11  ;;  %v1094_v56 = vsub.f32 %v1062_v15, %v1840_v28  ;;  %v1095_v51 = vsub.f32 %v1063_v48, %v1824_v21 }
 0x36b   : > { %v1635_v57 = vpop.eup %1634  ;;  %v1032_v20 = vmax.f32 %v998_v55, 1e-24 }
 0x36c   : > { %v1001_v23 = vpop.xlane.xlu1 %1000  ;;  %1158 = vadd.xlane.f32.xlu1 %v1157_v54  ;;  %v1126_v0 = vmul.f32 %v1094_v56, %v1094_v56  ;;  %v1127_v3 = vmul.f32 %v1095_v51, %v1095_v51  ;;  %v1064_v7 = vmul.f32 %v1635_v57, %v2051_v2  ;;  %v1065_v9 = vmul.f32 %v1635_v57, %v2056_v5 }
 0x36d   : > { %1640 = vrsqrt.f32 %v1032_v20  ;;  %v1033_v61 = vmax.f32 %v1001_v23, 1e-24 }
 0x36e   : > { %v1160_v63 = vadd.f32 %v1127_v3, %v1126_v0  ;;  %v1096_v50 = vsub.f32 %v1064_v7, %v1843_v29  ;;  %v1097_v26 = vsub.f32 %v1065_v9, %v1693_v8 }
 0x36f   : > { %v1637_v28 = vpop.eup %1636  ;;  %1642 = vrsqrt.f32 %v1033_v61 }
 0x370   : > { %1161 = vadd.xlane.f32.xlu0 %v1160_v63  ;;  %v1128_v21 = vmul.f32 %v1096_v50, %v1096_v50  ;;  %v1129_v52 = vmul.f32 %v1097_v26, %v1097_v26  ;;  %v1066_v32 = vmul.f32 %v1637_v28, %v2065_v27  ;;  %v1067_v33 = vmul.f32 %v1637_v28, %v2068_v10 }
 0x371   : > { %v1639_v12 = vpop.eup %1638 }
 0x372   : > { %v1004_v2 = vpop.xlane.xlu0 %1003  ;;  %v1163_v38 = vadd.f32 %v1129_v52, %v1128_v21  ;;  %v1098_v5 = vsub.f32 %v1066_v32, %v1856_v34  ;;  %v1099_v13 = vsub.f32 %v1067_v33, %v1846_v30  ;;  %v1068_v29 = vmul.f32 %v1639_v12, %v2073_v39  ;;  %v1694_v52 = vld [vmem:[%s1789_s17 + $0x88] sm:$0xff] }
 0x373   : > { %v1034_v11 = vmax.f32 %v1004_v2, 1e-24  ;;  %v1069_v19 = vmul.f32 %v1639_v12, %v2078_v43 }
 0x374   : > { %v1007_v15 = vpop.xlane.xlu1 %1006  ;;  %1164 = vadd.xlane.f32.xlu1 %v1163_v38  ;;  %v1130_v48 = vmul.f32 %v1098_v5, %v1098_v5  ;;  %v1131_v55 = vmul.f32 %v1099_v13, %v1099_v13  ;;  %v1100_v27 = vsub.f32 %v1068_v29, %v1859_v35  ;;  %v1695_v29 = vld [vmem:[%s1789_s17 + $0x90] sm:$0xff] }
 0x375   : > { %1644 = vrsqrt.f32 %v1034_v11  ;;  %v1035_v10 = vmax.f32 %v1007_v15, 1e-24  ;;  %v1101_v54 = vsub.f32 %v1069_v19, %v1849_v31  ;;  %v1696_v11 = vld [vmem:[%s1789_s17 + $0x98] sm:$0xff] }
 0x376   : > { %v1166_v56 = vadd.f32 %v1131_v55, %v1130_v48  ;;  %v1132_v51 = vmul.f32 %v1100_v27, %v1100_v27 }
 0x377   : > { %v1641_v34 = vpop.eup %1640  ;;  %1646 = vrsqrt.f32 %v1035_v10  ;;  %v1133_v30 = vmul.f32 %v1101_v54, %v1101_v54 }
 0x378   : > { %1167 = vadd.xlane.f32.xlu0 %v1166_v56  ;;  %v1070_v39 = vmul.f32 %v1641_v34, %v2085_v16  ;;  %v1071_v43 = vmul.f32 %v1641_v34, %v2088_v49  ;;  %v1697_v56 = vld [vmem:[%s1789_s17 + $0xa0] sm:$0xff]  ;;  %v1698_v34 = vld [vmem:[%s1789_s17 + $0xa8] sm:$0xff] }
 0x379   : > { %v1643_v57 = vpop.eup %1642  ;;  %v1169_v20 = vadd.f32 %v1133_v30, %v1132_v51 }
 0x37a   : > { %v1010_v23 = vpop.xlane.xlu0 %1009  ;;  %v1102_v0 = vsub.f32 %v1070_v39, %v1872_v40  ;;  %v1103_v35 = vsub.f32 %v1071_v43, %v1862_v36  ;;  %v1072_v3 = vmul.f32 %v1643_v57, %v2093_v18  ;;  %v1073_v31 = vmul.f32 %v1643_v57, %v2098_v22 }
 0x37b   : > { %1170 = vadd.xlane.f32.xlu1 %v1169_v20  ;;  %v1036_v7 = vmax.f32 %v1010_v23, 1e-24 }
 0x37c   : > { %v1013_v9 = vpop.xlane.xlu1 %1012  ;;  %v1134_v61 = vmul.f32 %v1102_v0, %v1102_v0  ;;  %v1135_v63 = vmul.f32 %v1103_v35, %v1103_v35  ;;  %v1104_v16 = vsub.f32 %v1072_v3, %v1875_v41  ;;  %v1105_v49 = vsub.f32 %v1073_v31, %v1865_v37  ;;  %v1699_v35 = vld [vmem:[%s1789_s17 + $0xb0] sm:$0xff] }
 0x37d   : > { %1648 = vrsqrt.f32 %v1036_v7  ;;  %v1037_v50 = vmax.f32 %v1013_v9, 1e-24 }
 0x37e   : > { %v1172_v8 = vadd.f32 %v1135_v63, %v1134_v61  ;;  %v1136_v40 = vmul.f32 %v1104_v16, %v1104_v16  ;;  %v1137_v26 = vmul.f32 %v1105_v49, %v1105_v49 }
 0x37f   : > { %v1645_v36 = vpop.eup %1644  ;;  %1650 = vrsqrt.f32 %v1037_v50  ;;  %v1701_v50 = vld [vmem:[%s1789_s17 + $0xc0] sm:$0xff] }
 0x380   : > { %1173 = vadd.xlane.f32.xlu0 %v1172_v8  ;;  %v1175_v18 = vadd.f32 %v1137_v26, %v1136_v40  ;;  %v1074_v22 = vmul.f32 %v1645_v36, %v2105_v62  ;;  %v1075_v28 = vmul.f32 %v1645_v36, %v2108_v1  ;;  %v1702_v40 = vld [vmem:[%s1789_s17 + $0xc8] sm:$0xff] }
 0x381   : > { %v1647_v21 = vpop.eup %1646 }
 0x382   : > { %1176 = vadd.xlane.f32.xlu1 %v1175_v18  ;;  %v1016_v41 = vpop.xlane.xlu0 %1015  ;;  %v1106_v37 = vsub.f32 %v1074_v22, %v1882_v46  ;;  %v1107_v32 = vsub.f32 %v1075_v28, %v1694_v52  ;;  %v1076_v33 = vmul.f32 %v1647_v21, %v2113_v6  ;;  %v1077_v12 = vmul.f32 %v1647_v21, %v2118_v24  ;;  %v1703_v21 = vld [vmem:[%s1789_s17 + $0xd0] sm:$0xff] }
 0x383   : > { %v1038_v2 = vmax.f32 %v1016_v41, 1e-24 }
 0x384   : > { %v1019_v38 = vpop.xlane.xlu1 %1018  ;;  %v1138_v5 = vmul.f32 %v1106_v37, %v1106_v37  ;;  %v1139_v13 = vmul.f32 %v1107_v32, %v1107_v32  ;;  %v1108_v62 = vsub.f32 %v1076_v33, %v1695_v29  ;;  %v1109_v1 = vsub.f32 %v1077_v12, %v1696_v11  ;;  %v1704_v37 = vld [vmem:[%s1789_s17 + $0xd8] sm:$0xff] }
 0x385   : > { %1652 = vrsqrt.f32 %v1038_v2  ;;  %v1039_v19 = vmax.f32 %v1019_v38, 1e-24  ;;  %v1705_v38 = vld [vmem:[%s1789_s17 + $0xe0] sm:$0xff] }
 0x386   : > { %v1178_v15 = vadd.f32 %v1139_v13, %v1138_v5  ;;  %v1140_v46 = vmul.f32 %v1108_v62, %v1108_v62  ;;  %v1141_v48 = vmul.f32 %v1109_v1, %v1109_v1  ;;  %v1706_v13 = vld [vmem:[%s1789_s17 + $0xe8] sm:$0xff] }
 0x387   : > { %v1649_v55 = vpop.eup %1648  ;;  %1654 = vrsqrt.f32 %v1039_v19 }
 0x388   : > { %1179 = vadd.xlane.f32.xlu0 %v1178_v15  ;;  %v1181_v6 = vadd.f32 %v1141_v48, %v1140_v46  ;;  %v1078_v24 = vmul.f32 %v1649_v55, %v2125_v42  ;;  %v1079_v27 = vmul.f32 %v1649_v55, %v2128_v44  ;;  %v1700_v44 = vld [vmem:[%s1789_s17 + $0xb8] sm:$0xff]  ;;  %v1707_v15 = vld [vmem:[%s1789_s17 + $0xf0] sm:$0xff] }
 0x389   : > { %v1651_v10 = vpop.eup %1650  ;;  %v1708_v48 = vld [vmem:[%s1789_s17 + $0xf8] sm:$0xff]  ;;  %s2252_s17 = scalar_lea.vmem %s2294_s5, %s1396_s21 }
 0x38a   : > { %1182 = vadd.xlane.f32.xlu1 %v1181_v6  ;;  %v1022_v54 = vpop.xlane.xlu0 %1021  ;;  %v1110_v51 = vsub.f32 %v1078_v24, %v1697_v56  ;;  %v1111_v30 = vsub.f32 %v1079_v27, %v1698_v34  ;;  %v1080_v39 = vmul.f32 %v1651_v10, %v2133_v45  ;;  %v1081_v43 = vmul.f32 %v1651_v10, %v2138_v17 }
 0x38b   : > { %v1040_v57 = vmax.f32 %v1022_v54, 1e-24 }
 0x38c   : > { %v1025_v20 = vpop.xlane.xlu1 %1024  ;;  %v1142_v23 = vmul.f32 %v1110_v51, %v1110_v51  ;;  %v1143_v0 = vmul.f32 %v1111_v30, %v1111_v30  ;;  %v1112_v42 = vsub.f32 %v1080_v39, %v1699_v35  ;;  %v1113_v3 = vsub.f32 %v1081_v43, %v1700_v44 }
 0x38d   : > { %1656 = vrsqrt.f32 %v1040_v57  ;;  %v1041_v31 = vmax.f32 %v1025_v20, 1e-24 }
 0x38e   : > { %v1184_v7 = vadd.f32 %v1143_v0, %v1142_v23  ;;  %v1144_v9 = vmul.f32 %v1112_v42, %v1112_v42  ;;  %v1145_v61 = vmul.f32 %v1113_v3, %v1113_v3 }
 0x38f   : > { %v1653_v63 = vpop.eup %1652  ;;  %1658 = vrsqrt.f32 %v1041_v31 }
 0x390   : > { %1185 = vadd.xlane.f32.xlu0 %v1184_v7  ;;  %v1187_v45 = vadd.f32 %v1145_v61, %v1144_v9  ;;  %v1082_v17 = vmul.f32 %v1653_v63, %v2145_v59  ;;  %v1083_v16 = vmul.f32 %v1653_v63, %v2148_v60 }
 0x391   : > { %v1655_v49 = vpop.eup %1654 }
 0x392   : > { %1188 = vadd.xlane.f32.xlu1 %v1187_v45  ;;  %v1114_v8 = vsub.f32 %v1082_v17, %v1701_v50  ;;  %v1115_v26 = vsub.f32 %v1083_v16, %v1702_v40  ;;  %v1084_v36 = vmul.f32 %v1655_v49, %v2153_v4  ;;  %v1085_v18 = vmul.f32 %v1655_v49, %v2158_v25 }
 0x394   : > { %v1146_v22 = vmul.f32 %v1114_v8, %v1114_v8  ;;  %v1147_v28 = vmul.f32 %v1115_v26, %v1115_v26  ;;  %v1116_v41 = vsub.f32 %v1084_v36, %v1703_v21  ;;  %v1117_v59 = vsub.f32 %v1085_v18, %v1704_v37 }
 0x396   : > { %v1190_v52 = vadd.f32 %v1147_v28, %v1146_v22  ;;  %v1148_v60 = vmul.f32 %v1116_v41, %v1116_v41  ;;  %v1149_v32 = vmul.f32 %v1117_v59, %v1117_v59 }
 0x397   : > { %v1657_v33 = vpop.eup %1656 }
 0x398   : > { %1191 = vadd.xlane.f32.xlu0 %v1190_v52  ;;  %v1193_v12 = vadd.f32 %v1149_v32, %v1148_v60  ;;  %v1086_v4 = vmul.f32 %v1657_v33, %v2165_v14  ;;  %v1087_v25 = vmul.f32 %v1657_v33, %v2168_v47 }
 0x399   : > { %v1659_v2 = vpop.eup %1658 }
 0x39a   : > { %1194 = vadd.xlane.f32.xlu1 %v1193_v12  ;;  %v1118_v5 = vsub.f32 %v1086_v4, %v1705_v38  ;;  %v1119_v29 = vsub.f32 %v1087_v25, %v1706_v13  ;;  %v1088_v62 = vmul.f32 %v1659_v2, %v2173_v53  ;;  %v1089_v11 = vmul.f32 %v1659_v2, %v2178_v58 }
 0x39c   : > { %v1150_v1 = vmul.f32 %v1118_v5, %v1118_v5  ;;  %v1151_v19 = vmul.f32 %v1119_v29, %v1119_v29  ;;  %v1120_v46 = vsub.f32 %v1088_v62, %v1707_v15  ;;  %v1121_v55 = vsub.f32 %v1089_v11, %v1708_v48 }
 0x39e   : > { %v1196_v14 = vadd.f32 %v1151_v19, %v1150_v1  ;;  %v1152_v6 = vmul.f32 %v1120_v46, %v1120_v46  ;;  %v1153_v47 = vmul.f32 %v1121_v55, %v1121_v55 }
 0x3a0   : > { %1197 = vadd.xlane.f32.xlu0 %v1196_v14  ;;  %v1199_v24 = vadd.f32 %v1153_v47, %v1152_v6 }
 0x3a2   : > { %1200 = vadd.xlane.f32.xlu1 %v1199_v24 }
 0x3f5   : > { %v1156_v27 = vpop.xlane.xlu0 %1155 }
 0x3f6   : > { %1660 = vrsqrt.f32 %v1156_v27  ;;  %vm1204_vm1 = vcmp.eq.f32.partialorder %v1156_v27, inf  ;;  %v1207_v51 = vand.u32 2147483648, %v1156_v27  ;;  %vm1206_vm2 = vcmp.eq.f32.partialorder %v1156_v27, 0.0 }
 0x3f9   : > { %v1159_v10 = vpop.xlane.xlu1 %1158 }
 0x3fa   : > { %1662 = vrsqrt.f32 %v1159_v10  ;;  %vm1211_vm3 = vcmp.eq.f32.partialorder %v1159_v10, inf  ;;  %v1214_v20 = vand.u32 2147483648, %v1159_v10  ;;  %vm1213_vm4 = vcmp.eq.f32.partialorder %v1159_v10, 0.0 }
 0x3fd   : > { %v1162_v53 = vpop.xlane.xlu0 %1161 }
 0x3fe   : > { %1664 = vrsqrt.f32 %v1162_v53  ;;  %vm1218_vm5 = vcmp.eq.f32.partialorder %v1162_v53, inf  ;;  %v1221_v3 = vand.u32 2147483648, %v1162_v53  ;;  %vm1220_vm6 = vcmp.eq.f32.partialorder %v1162_v53, 0.0 }
 0x400   : > { %v1661_v58 = vpop.eup %1660 }
 0x401   : > { %v1203_v54 = vmul.f32 %v1661_v58, %v1156_v27  ;;  %v1165_v56 = vpop.xlane.xlu1 %1164 }
 0x402   : > { %1666 = vrsqrt.f32 %v1165_v56  ;;  %vm1225_vm7 = vcmp.eq.f32.partialorder %v1165_v56, inf  ;;  %v1228_v45 = vand.u32 2147483648, %v1165_v56  ;;  %vm1227_vm8 = vcmp.eq.f32.partialorder %v1165_v56, 0.0 }
 0x403   : > { %v1205_v34 = vsel %vm1204_vm1, %v1156_v27, %v1203_v54 }
 0x404   : > { %v1663_v30 = vpop.eup %1662  ;;  %v1208_v39 = vsel %vm1206_vm2, %v1207_v51, %v1205_v34 }
 0x405   : > { %1315 = vst.msk [vmem:[%s2252_s17] sm:$0xff] %vm1314_vm0, %v1208_v39  ;;  %v1210_v43 = vmul.f32 %v1663_v30, %v1159_v10  ;;  %v1168_v57 = vpop.xlane.xlu0 %1167 }
 0x406   : > { %1668 = vrsqrt.f32 %v1168_v57  ;;  %vm1232_vm9 = vcmp.eq.f32.partialorder %v1168_v57, inf  ;;  %v1235_v40 = vand.u32 2147483648, %v1168_v57  ;;  %vm1234_vm10 = vcmp.eq.f32.partialorder %v1168_v57, 0.0 }
 0x407   : > { %v1212_v23 = vsel %vm1211_vm3, %v1159_v10, %v1210_v43 }
 0x408   : > { %v1665_v0 = vpop.eup %1664  ;;  %v1215_v35 = vsel %vm1213_vm4, %v1214_v20, %v1212_v23  ;;  %v1171_v42 = vpop.xlane.xlu1 %1170 }
 0x409   : > { %1316 = vst.msk [vmem:[%s2252_s17 + $0x8] sm:$0xff] %vm1314_vm0, %v1215_v35  ;;  %v1217_v44 = vmul.f32 %v1665_v0, %v1162_v53  ;;  %1670 = vrsqrt.f32 %v1171_v42  ;;  %vm1239_vm11 = vcmp.eq.f32.partialorder %v1171_v42, inf  ;;  %v1242_v28 = vand.u32 2147483648, %v1171_v42 }
 0x40a   : > { %vm1241_vm12 = vcmp.eq.f32.partialorder %v1171_v42, 0.0 }
 0x40b   : > { %v1219_v31 = vsel %vm1218_vm5, %v1162_v53, %v1217_v44 }
 0x40c   : > { %v1667_v7 = vpop.eup %1666  ;;  %v1222_v9 = vsel %vm1220_vm6, %v1221_v3, %v1219_v31 }
 0x40d   : > { %1317 = vst.msk [vmem:[%s2252_s17 + $0x10] sm:$0xff] %vm1314_vm0, %v1222_v9  ;;  %v1224_v61 = vmul.f32 %v1667_v7, %v1165_v56  ;;  %v1174_v63 = vpop.xlane.xlu0 %1173 }
 0x40e   : > { %1672 = vrsqrt.f32 %v1174_v63  ;;  %vm1246_vm13 = vcmp.eq.f32.partialorder %v1174_v63, inf  ;;  %v1249_v33 = vand.u32 2147483648, %v1174_v63  ;;  %vm1248_vm14 = vcmp.eq.f32.partialorder %v1174_v63, 0.0 }
 0x40f   : > { %v1226_v17 = vsel %vm1225_vm7, %v1165_v56, %v1224_v61  ;;  %v1177_v16 = vpop.xlane.xlu1 %1176 }
 0x410   : > { %v1669_v49 = vpop.eup %1668  ;;  %v1229_v50 = vsel %vm1227_vm8, %v1228_v45, %v1226_v17  ;;  %1674 = vrsqrt.f32 %v1177_v16  ;;  %vm1253_vm15 = vcmp.eq.f32.partialorder %v1177_v16, inf  ;;  %v1256_v2 = vand.u32 2147483648, %v1177_v16 }
 0x411   : > { %1318 = vst.msk [vmem:[%s2252_s17 + $0x18] sm:$0xff] %vm1314_vm0, %v1229_v50  ;;  %v1231_v8 = vmul.f32 %v1669_v49, %v1168_v57  ;;  %vm1255_vm1 = vcmp.eq.f32.partialorder %v1177_v16, 0.0 }
 0x413   : > { %v1671_v26 = vpop.eup %1670  ;;  %v1233_v36 = vsel %vm1232_vm9, %v1168_v57, %v1231_v8 }
 0x414   : > { %v1236_v18 = vsel %vm1234_vm10, %v1235_v40, %v1233_v36  ;;  %v1238_v22 = vmul.f32 %v1671_v26, %v1171_v42 }
 0x415   : > { %1319 = vst.msk [vmem:[%s2252_s17 + $0x20] sm:$0xff] %vm1314_vm0, %v1236_v18  ;;  %v1180_v21 = vpop.xlane.xlu0 %1179 }
 0x416   : > { %v1240_v41 = vsel %vm1239_vm11, %v1171_v42, %v1238_v22  ;;  %1676 = vrsqrt.f32 %v1180_v21  ;;  %vm1260_vm2 = vcmp.eq.f32.partialorder %v1180_v21, inf  ;;  %v1263_v19 = vand.u32 2147483648, %v1180_v21 }
 0x417   : > { %v1243_v37 = vsel %vm1241_vm12, %v1242_v28, %v1240_v41  ;;  %v1183_v59 = vpop.xlane.xlu1 %1182  ;;  %vm1262_vm3 = vcmp.eq.f32.partialorder %v1180_v21, 0.0 }
 0x418   : > { %v1673_v52 = vpop.eup %1672  ;;  %1320 = vst.msk [vmem:[%s2252_s17 + $0x28] sm:$0xff] %vm1314_vm0, %v1243_v37  ;;  %1678 = vrsqrt.f32 %v1183_v59  ;;  %vm1267_vm4 = vcmp.eq.f32.partialorder %v1183_v59, inf  ;;  %v1270_v55 = vand.u32 2147483648, %v1183_v59  ;;  %vm1269_vm5 = vcmp.eq.f32.partialorder %v1183_v59, 0.0 }
 0x419   : > { %v1245_v60 = vmul.f32 %v1673_v52, %v1174_v63 }
 0x41a   : > { %v1675_v32 = vpop.eup %1674 }
 0x41b   : > { %v1247_v12 = vsel %vm1246_vm13, %v1174_v63, %v1245_v60  ;;  %v1252_v4 = vmul.f32 %v1675_v32, %v1177_v16 }
 0x41c   : > { %v1250_v25 = vsel %vm1248_vm14, %v1249_v33, %v1247_v12 }
 0x41d   : > { %1321 = vst.msk [vmem:[%s2252_s17 + $0x30] sm:$0xff] %vm1314_vm0, %v1250_v25  ;;  %v1254_v38 = vsel %vm1253_vm15, %v1177_v16, %v1252_v4  ;;  %v1186_v5 = vpop.xlane.xlu0 %1185 }
 0x41e   : > { %v1257_v13 = vsel %vm1255_vm1, %v1256_v2, %v1254_v38  ;;  %1680 = vrsqrt.f32 %v1186_v5  ;;  %vm1274_vm6 = vcmp.eq.f32.partialorder %v1186_v5, inf  ;;  %v1277_v58 = vand.u32 2147483648, %v1186_v5 }
 0x41f   : > { %1322 = vst.msk [vmem:[%s2252_s17 + $0x38] sm:$0xff] %vm1314_vm0, %v1257_v13  ;;  %v1189_v29 = vpop.xlane.xlu1 %1188  ;;  %vm1276_vm7 = vcmp.eq.f32.partialorder %v1186_v5, 0.0 }
 0x420   : > { %v1677_v62 = vpop.eup %1676  ;;  %1682 = vrsqrt.f32 %v1189_v29  ;;  %vm1281_vm8 = vcmp.eq.f32.partialorder %v1189_v29, inf  ;;  %v1284_v34 = vand.u32 2147483648, %v1189_v29  ;;  %vm1283_vm9 = vcmp.eq.f32.partialorder %v1189_v29, 0.0 }
 0x421   : > { %v1259_v11 = vmul.f32 %v1677_v62, %v1180_v21 }
 0x422   : > { %v1679_v1 = vpop.eup %1678 }
 0x423   : > { %v1261_v15 = vsel %vm1260_vm2, %v1180_v21, %v1259_v11  ;;  %v1266_v46 = vmul.f32 %v1679_v1, %v1183_v59 }
 0x424   : > { %v1264_v48 = vsel %vm1262_vm3, %v1263_v19, %v1261_v15 }
 0x425   : > { %1323 = vst.msk [vmem:[%s2252_s17 + $0x40] sm:$0xff] %vm1314_vm0, %v1264_v48  ;;  %v1268_v14 = vsel %vm1267_vm4, %v1183_v59, %v1266_v46  ;;  %v1192_v6 = vpop.xlane.xlu0 %1191 }
 0x426   : > { %v1271_v47 = vsel %vm1269_vm5, %v1270_v55, %v1268_v14  ;;  %1684 = vrsqrt.f32 %v1192_v6  ;;  %vm1288_vm10 = vcmp.eq.f32.partialorder %v1192_v6, inf  ;;  %v1291_v35 = vand.u32 2147483648, %v1192_v6 }
 0x427   : > { %1324 = vst.msk [vmem:[%s2252_s17 + $0x48] sm:$0xff] %vm1314_vm0, %v1271_v47  ;;  %v1195_v24 = vpop.xlane.xlu1 %1194  ;;  %vm1290_vm11 = vcmp.eq.f32.partialorder %v1192_v6, 0.0 }
 0x428   : > { %v1681_v27 = vpop.eup %1680  ;;  %1686 = vrsqrt.f32 %v1195_v24  ;;  %vm1295_vm12 = vcmp.eq.f32.partialorder %v1195_v24, inf  ;;  %v1298_v31 = vand.u32 2147483648, %v1195_v24  ;;  %vm1297_vm13 = vcmp.eq.f32.partialorder %v1195_v24, 0.0 }
 0x429   : > { %v1273_v10 = vmul.f32 %v1681_v27, %v1186_v5 }
 0x42a   : > { %v1683_v53 = vpop.eup %1682 }
 0x42b   : > { %v1275_v54 = vsel %vm1274_vm6, %v1186_v5, %v1273_v10  ;;  %v1280_v56 = vmul.f32 %v1683_v53, %v1189_v29 }
 0x42c   : > { %v1278_v51 = vsel %vm1276_vm7, %v1277_v58, %v1275_v54 }
 0x42d   : > { %1325 = vst.msk [vmem:[%s2252_s17 + $0x50] sm:$0xff] %vm1314_vm0, %v1278_v51  ;;  %v1282_v30 = vsel %vm1281_vm8, %v1189_v29, %v1280_v56  ;;  %v1198_v39 = vpop.xlane.xlu0 %1197 }
 0x42e   : > { %v1285_v43 = vsel %vm1283_vm9, %v1284_v34, %v1282_v30  ;;  %1688 = vrsqrt.f32 %v1198_v39  ;;  %vm1302_vm14 = vcmp.eq.f32.partialorder %v1198_v39, inf  ;;  %v1305_v17 = vand.u32 2147483648, %v1198_v39 }
 0x42f   : > { %1326 = vst.msk [vmem:[%s2252_s17 + $0x58] sm:$0xff] %vm1314_vm0, %v1285_v43  ;;  %v1201_v57 = vpop.xlane.xlu1 %1200  ;;  %vm1304_vm15 = vcmp.eq.f32.partialorder %v1198_v39, 0.0 }
 0x430   : > { %v1685_v20 = vpop.eup %1684  ;;  %1690 = vrsqrt.f32 %v1201_v57  ;;  %vm1309_vm1 = vcmp.eq.f32.partialorder %v1201_v57, inf  ;;  %v1312_v8 = vand.u32 2147483648, %v1201_v57  ;;  %vm1311_vm2 = vcmp.eq.f32.partialorder %v1201_v57, 0.0 }
 0x431   : > { %v1287_v23 = vmul.f32 %v1685_v20, %v1192_v6 }
 0x432   : > { %v1687_v0 = vpop.eup %1686 }
 0x433   : > { %v1289_v42 = vsel %vm1288_vm10, %v1192_v6, %v1287_v23  ;;  %v1294_v44 = vmul.f32 %v1687_v0, %v1195_v24 }
 0x434   : > { %v1292_v3 = vsel %vm1290_vm11, %v1291_v35, %v1289_v42 }
 0x435   : > { %1327 = vst.msk [vmem:[%s2252_s17 + $0x60] sm:$0xff] %vm1314_vm0, %v1292_v3  ;;  %v1296_v7 = vsel %vm1295_vm12, %v1195_v24, %v1294_v44 }
 0x436   : > { %v1299_v9 = vsel %vm1297_vm13, %v1298_v31, %v1296_v7 }
 0x437   : > { %1328 = vst.msk [vmem:[%s2252_s17 + $0x68] sm:$0xff] %vm1314_vm0, %v1299_v9 }
 0x438   : > { %v1689_v61 = vpop.eup %1688 }
 0x439   : > { %v1301_v63 = vmul.f32 %v1689_v61, %v1198_v39 }
 0x43a   : > { %v1691_v45 = vpop.eup %1690 }
 0x43b   : > { %v1303_v16 = vsel %vm1302_vm14, %v1198_v39, %v1301_v63  ;;  %v1308_v49 = vmul.f32 %v1691_v45, %v1201_v57 }
 0x43c   : > { %v1306_v50 = vsel %vm1304_vm15, %v1305_v17, %v1303_v16 }
 0x43d   : > { %1329 = vst.msk [vmem:[%s2252_s17 + $0x70] sm:$0xff] %vm1314_vm0, %v1306_v50  ;;  %v1310_v40 = vsel %vm1309_vm1, %v1201_v57, %v1308_v49 }
 0x43e   : > { %v1313_v26 = vsel %vm1311_vm2, %v1312_v8, %v1310_v40 }
 0x43f   : > { %1330 = vst.msk [vmem:[%s2252_s17 + $0x78] sm:$0xff] %vm1314_vm0, %v1313_v26 }
 0x440 PF: > { %s15_s18 = sadd.s32 1, %s1715_s18  }
 0x441   : > { %p12_p4 = scmp.ge.s32.totalorder %s15_s18, 6  }
 0x443   :  { %14 = sbr.rel (!%p12_p4) target bundleno = 1 (0x1), region = 71 }

</bundles_post_ra>
